<compile_context>
chip_gen: v5e
topology: v5e:2x2
jax: 0.10.0
libtpu: 0.0.40
codegen_flags: <defaults>
</compile_context>

<pallas_src>
import functools

import jax
import jax.numpy as jnp
from jax.experimental import pallas as pl
from jax.experimental.pallas import tpu as pltpu

DIMS = (128, 256, 512, 1024)   # ConvNeXt-Base widths
DEPTHS = (3, 3, 27, 3)         # ConvNeXt-Base depths
LN_EPS = 1e-6
LAYER_SCALE_INIT = 1e-6
_SQRT_2_OVER_PI = 0.7978845608028654


def _tpu_generation():
    try:
        kind = jax.devices()[0].device_kind.lower()
    except Exception:
        return 6
    if "v4" in kind:
        return 4
    if "v5" in kind:
        return 5
    if "v6" in kind:
        return 6
    if "v7" in kind or "7x" in kind:
        return 7
    return 6


_GEN = _tpu_generation()
_VMEM_LIMIT = (32 if _GEN >= 7 else 64) * 1024 * 1024   # v7x has 64 MiB physical / TC
_ROW_BYTES = (2 if _GEN >= 7 else 4) * 1024 * 1024      # f32 bytes per row tile target
_GELU_BF16 = _GEN >= 6                                   # v5e/v4 have no bf16 VALU


def _row_tile(M, width):
    """Row-tile size so the widest f32 (rows, width) operand is ~_ROW_BYTES."""
    tm = (_ROW_BYTES // (width * 4)) // 128 * 128
    tm = max(128, min(2048, tm))
    return M if M <= tm else tm


# ----------------------------------------------------------------------------
# Pallas kernels (constructed & jitted once per distinct shape via lru_cache)
# ----------------------------------------------------------------------------

@functools.lru_cache(maxsize=None)
def _linear_fn(M, K, N):
    """(M,K) @ (K,N) + bias.  Row-tiled; bf16 MXU operands (weights pre-cast), f32 accum."""
    tm = _row_tile(M, max(K, N))

    def kernel(x_ref, w_ref, b_ref, o_ref):
        o_ref[...] = (
            jnp.dot(x_ref[...].astype(jnp.bfloat16), w_ref[...],
                    preferred_element_type=jnp.float32)
            + b_ref[...]
        )

    def f(x, w, b):
        return pl.pallas_call(
            kernel,
            out_shape=jax.ShapeDtypeStruct((M, N), jnp.float32),
            grid=(pl.cdiv(M, tm),),
            in_specs=[
                pl.BlockSpec((tm, K), lambda i: (i, 0)),
                pl.BlockSpec((K, N), lambda i: (0, 0)),
                pl.BlockSpec((1, N), lambda i: (0, 0)),
            ],
            out_specs=pl.BlockSpec((tm, N), lambda i: (i, 0)),
            compiler_params=pltpu.CompilerParams(
                dimension_semantics=("parallel",),
                vmem_limit_bytes=_VMEM_LIMIT),
        )(x, w.astype(jnp.bfloat16), b.reshape(1, N))

    return jax.jit(f)


@functools.lru_cache(maxsize=None)
def _linear_ln_fn(M, K, C):
    """Fused stem: (M,K) @ (K,C) + bias  ->  LayerNorm over C (Conv2d 4x4/s4 + LayerNorm2d)."""
    tm = _row_tile(M, max(K, C))

    def kernel(x_ref, w_ref, cb_ref, g_ref, b_ref, o_ref):
        y = jnp.dot(x_ref[...].astype(jnp.bfloat16), w_ref[...],
                    preferred_element_type=jnp.float32) + cb_ref[...]
        mu = jnp.mean(y, axis=-1, keepdims=True)
        var = jnp.mean((y - mu) ** 2, axis=-1, keepdims=True)
        o_ref[...] = (y - mu) * jax.lax.rsqrt(var + LN_EPS) * g_ref[...] + b_ref[...]

    def f(x, w, cb, g, b):
        return pl.pallas_call(
            kernel,
            out_shape=jax.ShapeDtypeStruct((M, C), jnp.float32),
            grid=(pl.cdiv(M, tm),),
            in_specs=[
                pl.BlockSpec((tm, K), lambda i: (i, 0)),
                pl.BlockSpec((K, C), lambda i: (0, 0)),
                pl.BlockSpec((1, C), lambda i: (0, 0)),
                pl.BlockSpec((1, C), lambda i: (0, 0)),
                pl.BlockSpec((1, C), lambda i: (0, 0)),
            ],
            out_specs=pl.BlockSpec((tm, C), lambda i: (i, 0)),
            compiler_params=pltpu.CompilerParams(
                dimension_semantics=("parallel",),
                vmem_limit_bytes=_VMEM_LIMIT),
        )(x, w.astype(jnp.bfloat16), cb.reshape(1, C),
          g.reshape(1, C), b.reshape(1, C))

    return jax.jit(f)


@functools.lru_cache(maxsize=None)
def _ln_linear_fn(M, C, n_seg, N):
    """Fused pre-LN matmul: per-C-segment LayerNorm of (M, n_seg*C) rows, then @ (n_seg*C, N) + bias.

    Used for the downsample layers (LayerNorm2d + 2x2/s2 conv expressed as a patch matmul:
    each 4C patch row is four per-pixel C vectors normalized with the same gamma/beta,
    identical to LN-then-conv; n_seg=4) and the classifier LayerNorm2d + Linear (n_seg=1).
    """
    K = n_seg * C
    tm = _row_tile(M, max(K, N))

    def kernel(x_ref, g_ref, b_ref, w_ref, wb_ref, o_ref):
        x = x_ref[...]
        acc = None
        for s in range(n_seg):
            xs = x[:, s * C:(s + 1) * C]
            mu = jnp.mean(xs, axis=-1, keepdims=True)
            var = jnp.mean((xs - mu) ** 2, axis=-1, keepdims=True)
            xn = (xs - mu) * jax.lax.rsqrt(var + LN_EPS) * g_ref[...] + b_ref[...]
            d = jnp.dot(xn.astype(jnp.bfloat16), w_ref[s * C:(s + 1) * C, :],
                        preferred_element_type=jnp.float32)
            acc = d if acc is None else acc + d
        o_ref[...] = acc + wb_ref[...]

    def f(x, g, b, w, wb):
        return pl.pallas_call(
            kernel,
            out_shape=jax.ShapeDtypeStruct((M, N), jnp.float32),
            grid=(pl.cdiv(M, tm),),
            in_specs=[
                pl.BlockSpec((tm, K), lambda i: (i, 0)),
                pl.BlockSpec((1, C), lambda i: (0, 0)),
                pl.BlockSpec((1, C), lambda i: (0, 0)),
                pl.BlockSpec((K, N), lambda i: (0, 0)),
                pl.BlockSpec((1, N), lambda i: (0, 0)),
            ],
            out_specs=pl.BlockSpec((tm, N), lambda i: (i, 0)),
            compiler_params=pltpu.CompilerParams(
                dimension_semantics=("parallel",),
                vmem_limit_bytes=_VMEM_LIMIT),
        )(x, g.reshape(1, C), b.reshape(1, C),
          w.astype(jnp.bfloat16), wb.reshape(1, N))

    return jax.jit(f)


@functools.lru_cache(maxsize=None)
def _dwconv7_fn(N, H, W, C):
    """Depthwise 7x7 conv, stride 1, padding 3, on NHWC.  Grid over batch.

    A (H+6, W+6, C) zero-halo slab lives in VMEM scratch; only the 3-wide border is
    zeroed each grid step (cheap, and megacore-safe: no cross-iteration scratch state)
    and the interior is overwritten with the incoming tile.  The 49-tap accumulation is
    restructured into RH-row strips whose f32 accumulator stays in vregs across all 49
    taps, instead of a whole-image VMEM accumulator re-read/re-written per tap.
    """
    RH = 1
    for r in range(min(H, 8), 0, -1):
        if H % r == 0 and r * W * C * 4 <= 32 * 1024:   # strip accumulator <= ~8 vregs
            RH = r
            break
    n_strips = H // RH

    def kernel(x_ref, w_ref, b_ref, o_ref, xp_ref):
        # zero only the 3-wide halo border (top/bottom rows + left/right columns)
        xp_ref[0:3, :, :] = jnp.zeros((3, W + 6, C), jnp.float32)
        xp_ref[H + 3:H + 6, :, :] = jnp.zeros((3, W + 6, C), jnp.float32)
        xp_ref[:, 0:3, :] = jnp.zeros((H + 6, 3, C), jnp.float32)
        xp_ref[:, W + 3:W + 6, :] = jnp.zeros((H + 6, 3, C), jnp.float32)
        # interior <- input tile (pipelined block input)
        xp_ref[3:3 + H, 3:3 + W, :] = x_ref[0]

        w = w_ref[...]                                   # (7, 7, C)
        b = b_ref[...]                                   # (1, C)

        @pl.loop(0, n_strips)
        def _(r):
            h0 = r * RH
            acc = jnp.zeros((RH, W, C), jnp.float32)     # register-resident strip accum
            for kh in range(7):                          # fully unrolled 49 taps
                for kw in range(7):
                    acc = acc + xp_ref[pl.ds(h0 + kh, RH), kw:kw + W, :] * w[kh, kw]
            o_ref[0, pl.ds(h0, RH), :, :] = acc + b

    def f(x, w, b):
        # TODO(synk): tile H (3-row halo via manual DMA) to bound VMEM at large inputs and
        # feed both v7x TensorCores at batch 1-2, and DMA the tile straight into the slab
        # interior (memory_space=pl.ANY) to drop the VMEM->VMEM interior copy.
        return pl.pallas_call(
            kernel,
            out_shape=jax.ShapeDtypeStruct((N, H, W, C), jnp.float32),
            grid=(N,),
            in_specs=[
                pl.BlockSpec((1, H, W, C), lambda n: (n, 0, 0, 0)),
                pl.BlockSpec((7, 7, C), lambda n: (0, 0, 0)),
                pl.BlockSpec((1, C), lambda n: (0, 0)),
            ],
            out_specs=pl.BlockSpec((1, H, W, C), lambda n: (n, 0, 0, 0)),
            scratch_shapes=[pltpu.VMEM((H + 6, W + 6, C), jnp.float32)],
            compiler_params=pltpu.CompilerParams(
                dimension_semantics=("parallel",),
                vmem_limit_bytes=_VMEM_LIMIT),
        )(x, w, b.reshape(1, C))

    return jax.jit(f)


@functools.lru_cache(maxsize=None)
def _block_mlp_fn(M, C):
    """Fused CNBlock tail: LN -> Linear(C,4C) -> GELU -> Linear(4C,C) -> layer_scale -> +res.

    Grid = (row tiles ["parallel"], hidden tiles ["arbitrary"]).  LayerNorm is computed
    once per row tile (bf16 VMEM scratch) and reused across hidden tiles; the first
    hidden tile writes its matmul result straight into the resident output block and
    later hidden tiles accumulate into it.  Matmul operands are bf16 (weights pre-cast)
    with f32 accumulation; the GELU polynomial runs in bf16 on v6e/v7x, f32 on v5e/v4.
    """
    HID = 4 * C
    tm = _row_tile(M, C)
    th = min(HID, 512)          # 512-wide hidden tiles fill the 256x256 MXU on v6e/v7x
    n_hid = HID // th

    def kernel(x_ref, res_ref, g_ref, b_ref, w1_ref, b1_ref, w2_ref, b2_ref,
               ls_ref, o_ref, xn_ref):
        hi = pl.program_id(1)

        @pl.when(hi == 0)
        def _():
            x = x_ref[...]
            mu = jnp.mean(x, axis=-1, keepdims=True)
            var = jnp.mean((x - mu) ** 2, axis=-1, keepdims=True)
            xn = (x - mu) * jax.lax.rsqrt(var + LN_EPS) * g_ref[...] + b_ref[...]
            xn_ref[...] = xn.astype(jnp.bfloat16)

        h = jnp.dot(xn_ref[...], w1_ref[...],
                    preferred_element_type=jnp.float32) + b1_ref[...]
        # TODO(synk): torch nn.GELU() is exact (erf-based); tanh approximation used here
        # for robust TPU lowering (max abs deviation ~1e-3).
        if _GELU_BF16:
            h = h.astype(jnp.bfloat16)     # bf16 VALU on v6e/v7x halves GELU cost
        h = 0.5 * h * (1.0 + jnp.tanh(_SQRT_2_OVER_PI * h * (1.0 + 0.044715 * h * h)))
        contrib = jnp.dot(h.astype(jnp.bfloat16), w2_ref[...],
                          preferred_element_type=jnp.float32)

        @pl.when(hi == 0)
        def _():
            o_ref[...] = contrib

        @pl.when(hi != 0)
        def _():
            o_ref[...] += contrib

        @pl.when(hi == pl.num_programs(1) - 1)
        def _():
            o_ref[...] = res_ref[...] + ls_ref[...] * (o_ref[...] + b2_ref[...])

    def f(x, res, g, b, w1, b1, w2, b2, ls):
        return pl.pallas_call(
            kernel,
            out_shape=jax.ShapeDtypeStruct((M, C), jnp.float32),
            grid=(pl.cdiv(M, tm), n_hid),
            in_specs=[
                pl.BlockSpec((tm, C), lambda i, h: (i, 0)),   # dwconv output
                pl.BlockSpec((tm, C), lambda i, h: (i, 0)),   # residual (block input)
                pl.BlockSpec((1, C), lambda i, h: (0, 0)),    # LN gamma
                pl.BlockSpec((1, C), lambda i, h: (0, 0)),    # LN beta
                pl.BlockSpec((C, th), lambda i, h: (0, h)),   # W1 column tile (bf16)
                pl.BlockSpec((1, th), lambda i, h: (0, h)),   # b1 tile
                pl.BlockSpec((th, C), lambda i, h: (h, 0)),   # W2 row tile (bf16)
                pl.BlockSpec((1, C), lambda i, h: (0, 0)),    # b2
                pl.BlockSpec((1, C), lambda i, h: (0, 0)),    # layer scale
            ],
            out_specs=pl.BlockSpec((tm, C), lambda i, h: (i, 0)),
            scratch_shapes=[pltpu.VMEM((tm, C), jnp.bfloat16)],   # cached LN(x) per row tile
            compiler_params=pltpu.CompilerParams(
                dimension_semantics=("parallel", "arbitrary"),
                vmem_limit_bytes=_VMEM_LIMIT),
        )(x, res, g.reshape(1, C), b.reshape(1, C),
          w1.astype(jnp.bfloat16), b1.reshape(1, HID),
          w2.astype(jnp.bfloat16), b2.reshape(1, C), ls.reshape(1, C))

    return jax.jit(f)


# ----------------------------------------------------------------------------
# Model glue (reshapes / patch extraction / parameter plumbing)
# ----------------------------------------------------------------------------

def _patchify(x, p):
    """Non-overlapping p x p patches of NHWC x, flattened as (kh, kw, cin)."""
    N, H, W, C = x.shape
    x = x.reshape(N, H // p, p, W // p, p, C)
    x = x.transpose(0, 1, 3, 2, 4, 5)
    return x.reshape(N, H // p, W // p, p * p * C)


def _stem(x, p):
    # Conv2d(3,128,k=4,s=4) as patchify + matmul, with LayerNorm2d fused as an epilogue.
    N, H, W, _ = x.shape
    patches = _patchify(x, 4).reshape(-1, 4 * 4 * 3)
    rows = _linear_ln_fn(patches.shape[0], 4 * 4 * 3, DIMS[0])(
        patches, p["conv_w"], p["conv_b"], p["ln_g"], p["ln_b"])
    return rows.reshape(N, H // 4, W // 4, DIMS[0])


def _downsample(x, p):
    # LayerNorm2d + Conv2d(k=2,s=2): patchify first, then one fused per-pixel-LN + matmul.
    N, H, W, C = x.shape
    patches = _patchify(x, 2).reshape(-1, 4 * C)
    cout = p["conv_w"].shape[1]
    rows = _ln_linear_fn(patches.shape[0], C, 4, cout)(
        patches, p["ln_g"], p["ln_b"], p["conv_w"], p["conv_b"])
    return rows.reshape(N, H // 2, W // 2, cout)


def _cn_block(x, p):
    # TODO(synk): further fusion of the dwconv output directly into the MLP kernel (per
    # row tile) would save one write+read of y to HBM per block; bf16 inter-kernel
    # activations are another bandwidth lever left out to stay close to the f32 reference.
    N, H, W, C = x.shape
    y = _dwconv7_fn(N, H, W, C)(x, p["dw_w"], p["dw_b"])
    out = _block_mlp_fn(N * H * W, C)(
        y.reshape(N * H * W, C), x.reshape(N * H * W, C),
        p["ln_g"], p["ln_b"], p["w1"], p["b1"], p["w2"], p["b2"], p["ls"])
    return out.reshape(N, H, W, C)


def convnext_base_model_forward(x_nchw, params):
    """Forward of ConvNeXt_Base_Model (inference mode). Input NCHW float32."""
    x = jnp.transpose(x_nchw, (0, 2, 3, 1)).astype(jnp.float32)  # -> NHWC
    x = _stem(x, params["stem"])
    for si in range(4):
        for bp in params["stages"][si]:
            x = _cn_block(x, bp)
        if si < 3:
            x = _downsample(x, params["downs"][si])
    # AdaptiveAvgPool2d(1) + Flatten (spatial is 1x1 here; mean kept for generality)
    pooled = jnp.mean(x, axis=(1, 2))
    h = params["head"]
    # classifier LayerNorm2d(1024) fused into Linear(1024, 1000)
    logits = _ln_linear_fn(pooled.shape[0], DIMS[-1], 1, 1000)(
        pooled, h["ln_g"], h["ln_b"], h["fc_w"], h["fc_b"])
    # tail: nn.Dropout() is identity at inference.
    # TODO(synk): train-mode Dropout / StochasticDepth randomness not implemented.
    out = _linear_fn(pooled.shape[0], 1000, 10)(logits, h["tail_w"], h["tail_b"])
    return out


# ----------------------------------------------------------------------------
# Deterministic parameter initialization (synthetic; matches module shapes)
# ----------------------------------------------------------------------------

def init_params(seed=42):
    keys = list(jax.random.split(jax.random.PRNGKey(seed), 256))
    ctr = [0]

    def randn(shape, std=0.02, dtype=jnp.float32):
        k = keys[ctr[0]]
        ctr[0] += 1
        return (std * jax.random.normal(k, shape, jnp.float32)).astype(dtype)

    # Matmul weights are stored pre-transposed ((kh*kw*cin, cout) / (in, out)) and
    # pre-cast to bf16 (the MXU operand dtype) so no per-forward convert is needed.
    # TODO(synk): a real torch checkpoint loader must permute conv weights
    # (cout, cin, kh, kw) -> (kh, kw, cin, cout) exactly before reshape/cast.
    params = {}
    params["stem"] = dict(
        conv_w=randn((4 * 4 * 3, DIMS[0]), dtype=jnp.bfloat16),
        conv_b=jnp.zeros((DIMS[0],), jnp.float32),
        ln_g=jnp.ones((DIMS[0],), jnp.float32), ln_b=jnp.zeros((DIMS[0],), jnp.float32),
    )
    params["stages"] = []
    for dim, depth in zip(DIMS, DEPTHS):
        blocks = []
        for _ in range(depth):
            blocks.append(dict(
                dw_w=randn((7, 7, dim)), dw_b=jnp.zeros((dim,), jnp.float32),
                ln_g=jnp.ones((dim,), jnp.float32), ln_b=jnp.zeros((dim,), jnp.float32),
                w1=randn((dim, 4 * dim), dtype=jnp.bfloat16),
                b1=jnp.zeros((4 * dim,), jnp.float32),
                w2=randn((4 * dim, dim), dtype=jnp.bfloat16),
                b2=jnp.zeros((dim,), jnp.float32),
                ls=jnp.full((dim,), LAYER_SCALE_INIT, jnp.float32),
            ))
        params["stages"].append(blocks)
    params["downs"] = []
    for si in range(3):
        cin, cout = DIMS[si], DIMS[si + 1]
        params["downs"].append(dict(
            ln_g=jnp.ones((cin,), jnp.float32), ln_b=jnp.zeros((cin,), jnp.float32),
            conv_w=randn((2 * 2 * cin, cout), dtype=jnp.bfloat16),
            conv_b=jnp.zeros((cout,), jnp.float32),
        ))
    params["head"] = dict(
        ln_g=jnp.ones((DIMS[-1],), jnp.float32), ln_b=jnp.zeros((DIMS[-1],), jnp.float32),
        fc_w=randn((DIMS[-1], 1000), dtype=jnp.bfloat16),
        fc_b=jnp.zeros((1000,), jnp.float32),
        tail_w=randn((1000, 10), dtype=jnp.bfloat16),
        tail_b=jnp.zeros((10,), jnp.float32),
    )
    return params


if __name__ == "__main__":
    params = init_params()
    # Small input consistent with the module: NCHW, 3 channels, spatial divisible by 32.
    x = jax.random.normal(jax.random.PRNGKey(0), (2, 3, 32, 32), jnp.float32)
    out = convnext_base_model_forward(x, params)
    out = jax.block_until_ready(out)
    assert out.shape == (2, 10) and out.dtype == jnp.float32
    print("KERNEL_OK")
</pallas_src>

<mosaic_0001>
module attributes {stable_mosaic.version = 11 : i64} {
  func.func @kernel(%arg0: i32, %arg1: memref<128x48xf32, #tpu.memory_space<vmem>>, %arg2: memref<48x128xbf16, #tpu.memory_space<vmem>>, %arg3: memref<1x128xf32, #tpu.memory_space<vmem>>, %arg4: memref<1x128xf32, #tpu.memory_space<vmem>>, %arg5: memref<1x128xf32, #tpu.memory_space<vmem>>, %arg6: memref<128x128xf32, #tpu.memory_space<vmem>>) attributes {dimension_semantics = [#tpu.dimension_semantics<parallel>], iteration_bounds = array<i64: 1>, scalar_prefetch = 0 : i64, scratch_operands = 0 : i64, tpu.core_type = #tpu.core_type<tc>, window_params = [{transform_indices = @transform_0, window_bounds = array<i64: 128, 48>}, {pipeline_mode = #tpu.pipeline_mode<synchronous>, transform_indices = @transform_1, window_bounds = array<i64: 48, 128>}, {pipeline_mode = #tpu.pipeline_mode<synchronous>, transform_indices = @transform_2, window_bounds = array<i64: 1, 128>}, {pipeline_mode = #tpu.pipeline_mode<synchronous>, transform_indices = @transform_3, window_bounds = array<i64: 1, 128>}, {pipeline_mode = #tpu.pipeline_mode<synchronous>, transform_indices = @transform_4, window_bounds = array<i64: 1, 128>}, {transform_indices = @transform_5, window_bounds = array<i64: 128, 128>}]} {
    %c0 = arith.constant 0 : index
    %c0_0 = arith.constant 0 : index
    %0 = vector.load %arg1[%c0, %c0_0] : memref<128x48xf32, #tpu.memory_space<vmem>>, vector<128x48xf32>
    %1 = arith.truncf %0 : vector<128x48xf32> to vector<128x48xbf16>
    %c0_1 = arith.constant 0 : index
    %c0_2 = arith.constant 0 : index
    %2 = vector.load %arg2[%c0_1, %c0_2] : memref<48x128xbf16, #tpu.memory_space<vmem>>, vector<48x128xbf16>
    %cst = arith.constant dense<0.000000e+00> : vector<128x128xf32>
    %3 = tpu.matmul %1, %2, %cst {dimension_numbers = #tpu.dot_dimension_numbers<[1], [0], [0], [1], [0, 0, 1, 1], [], []>} : vector<128x48xbf16>, vector<48x128xbf16>, vector<128x128xf32> -> vector<128x128xf32>
    %c0_3 = arith.constant 0 : index
    %c0_4 = arith.constant 0 : index
    %4 = vector.load %arg3[%c0_3, %c0_4] : memref<1x128xf32, #tpu.memory_space<vmem>>, vector<1x128xf32>
    %5 = vector.broadcast %4 : vector<1x128xf32> to vector<128x128xf32>
    %6 = arith.addf %3, %5 : vector<128x128xf32>
    %cst_5 = arith.constant dense<0.000000e+00> : vector<128xf32>
    %7 = vector.multi_reduction <add>, %6, %cst_5 [1] : vector<128x128xf32> to vector<128xf32>
    %8 = vector.shape_cast %7 : vector<128xf32> to vector<128x1xf32>
    %cst_6 = arith.constant 1.280000e+02 : f32
    %9 = vector.broadcast %cst_6 : f32 to vector<128x1xf32>
    %10 = arith.divf %8, %9 : vector<128x1xf32>
    %11 = vector.broadcast %10 : vector<128x1xf32> to vector<128x128xf32>
    %12 = arith.subf %6, %11 : vector<128x128xf32>
    %13 = arith.mulf %12, %12 : vector<128x128xf32>
    %cst_7 = arith.constant dense<0.000000e+00> : vector<128xf32>
    %14 = vector.multi_reduction <add>, %13, %cst_7 [1] : vector<128x128xf32> to vector<128xf32>
    %15 = vector.shape_cast %14 : vector<128xf32> to vector<128x1xf32>
    %cst_8 = arith.constant 1.280000e+02 : f32
    %16 = vector.broadcast %cst_8 : f32 to vector<128x1xf32>
    %17 = arith.divf %15, %16 : vector<128x1xf32>
    %18 = vector.broadcast %10 : vector<128x1xf32> to vector<128x128xf32>
    %19 = arith.subf %6, %18 : vector<128x128xf32>
    %cst_9 = arith.constant 9.99999997E-7 : f32
    %20 = vector.broadcast %cst_9 : f32 to vector<128x1xf32>
    %21 = arith.addf %17, %20 : vector<128x1xf32>
    %22 = math.rsqrt %21 : vector<128x1xf32>
    %23 = vector.broadcast %22 : vector<128x1xf32> to vector<128x128xf32>
    %24 = arith.mulf %19, %23 : vector<128x128xf32>
    %c0_10 = arith.constant 0 : index
    %c0_11 = arith.constant 0 : index
    %25 = vector.load %arg4[%c0_10, %c0_11] : memref<1x128xf32, #tpu.memory_space<vmem>>, vector<1x128xf32>
    %26 = vector.broadcast %25 : vector<1x128xf32> to vector<128x128xf32>
    %27 = arith.mulf %24, %26 : vector<128x128xf32>
    %c0_12 = arith.constant 0 : index
    %c0_13 = arith.constant 0 : index
    %28 = vector.load %arg5[%c0_12, %c0_13] : memref<1x128xf32, #tpu.memory_space<vmem>>, vector<1x128xf32>
    %29 = vector.broadcast %28 : vector<1x128xf32> to vector<128x128xf32>
    %30 = arith.addf %27, %29 : vector<128x128xf32>
    %c0_14 = arith.constant 0 : index
    %c0_15 = arith.constant 0 : index
    %31 = vector.load %arg6[%c0_14, %c0_15] : memref<128x128xf32, #tpu.memory_space<vmem>>, vector<128x128xf32>
    tpu.vector_store %arg6[%c0_14, %c0_15], %30 {strides = array<i32>} : memref<128x128xf32, #tpu.memory_space<vmem>>, vector<128x128xf32>,
    return
  }
  func.func @transform_0(%arg0: i32) -> (i32, i32) {
    %c0_i32 = arith.constant 0 : i32
    %c0_i32_0 = arith.constant 0 : i32
    return %arg0, %c0_i32 : i32, i32
  }
  func.func @transform_1(%arg0: i32) -> (i32, i32) {
    %c0_i32 = arith.constant 0 : i32
    %c0_i32_0 = arith.constant 0 : i32
    %c0_i32_1 = arith.constant 0 : i32
    return %c0_i32, %c0_i32_0 : i32, i32
  }
  func.func @transform_2(%arg0: i32) -> (i32, i32) {
    %c0_i32 = arith.constant 0 : i32
    %c0_i32_0 = arith.constant 0 : i32
    %c0_i32_1 = arith.constant 0 : i32
    return %c0_i32, %c0_i32_0 : i32, i32
  }
  func.func @transform_3(%arg0: i32) -> (i32, i32) {
    %c0_i32 = arith.constant 0 : i32
    %c0_i32_0 = arith.constant 0 : i32
    %c0_i32_1 = arith.constant 0 : i32
    return %c0_i32, %c0_i32_0 : i32, i32
  }
  func.func @transform_4(%arg0: i32) -> (i32, i32) {
    %c0_i32 = arith.constant 0 : i32
    %c0_i32_0 = arith.constant 0 : i32
    %c0_i32_1 = arith.constant 0 : i32
    return %c0_i32, %c0_i32_0 : i32, i32
  }
  func.func @transform_5(%arg0: i32) -> (i32, i32) {
    %c0_i32 = arith.constant 0 : i32
    %c0_i32_0 = arith.constant 0 : i32
    return %arg0, %c0_i32 : i32, i32
  }
}

</mosaic_0001>

<bundles_post_ra>
// kernel: f.1
= control target key start
LH: loop header
LB: loop body
LE: loop exit
PB: predicated region body
PF: predicated region fallthrough
CT: control target
= control target key end

     0   :  { %s1052_s0 = inlined_call_operand.vmem [shape: f32[128,48], index: 0, kind: input, shape index: {}]   ;;  %s1053_s1 = inlined_call_operand.vmem [shape: bf16[48,128], index: 1, kind: input, shape index: {}]   ;;  %s1054_s2 = inlined_call_operand.vmem [shape: f32[1,128], index: 2, kind: input, shape index: {}]   ;;  %s1055_s3 = inlined_call_operand.vmem [shape: f32[1,128], index: 3, kind: input, shape index: {}]   ;;  %s1056_s4 = inlined_call_operand.vmem [shape: f32[1,128], index: 4, kind: input, shape index: {}]   ;;  %s1057_s5 = inlined_call_operand.hbm [shape: f32[128,128], index: 5, kind: output, shape index: {}]  }
   0x1   :  { %v571_v0 = vld [vmem:[%s1053_s1 + $0x10] sm:$0xff]  ;;  %v570_v1 = vld [vmem:[%s1053_s1 + $0x8] sm:$0xff]  ;;  %v569_v2 = vld [vmem:[%s1053_s1] sm:$0xff] }
   0x2   :  { %104 = vmatpush.bf16.msra.mxu0 %v571_v0  ;;  %572 = vmatpush.bf16.msra.mxu1 %v571_v0  ;;  %v22_v3 = vld [vmem:[%s1052_s0] sm:$0xff]  ;;  %v23_v4 = vld [vmem:[%s1052_s0 + $0x8] sm:$0xff] }
   0x3   :  { %573 = vmatpush.bf16.msra.mxu2 %v571_v0  ;;  %574 = vmatpush.bf16.msra.mxu3 %v571_v0  ;;  %v26_v5 = vld [vmem:[%s1052_s0 + $0x20] sm:$0xff]  ;;  %v27_v6 = vld [vmem:[%s1052_s0 + $0x28] sm:$0xff] }
   0x4   :  { %v30_v7 = vld [vmem:[%s1052_s0 + $0x40] sm:$0xff]  ;;  %v31_v8 = vld [vmem:[%s1052_s0 + $0x48] sm:$0xff] }
   0x5   :  { %v34_v9 = vld [vmem:[%s1052_s0 + $0x60] sm:$0xff]  ;;  %v35_v10 = vld [vmem:[%s1052_s0 + $0x68] sm:$0xff] }
   0x6   :  { %105 = vmatpush.bf16.msra.mxu0 %v570_v1  ;;  %575 = vmatpush.bf16.msra.mxu1 %v570_v1 }
   0x7   :  { %576 = vmatpush.bf16.msra.mxu2 %v570_v1  ;;  %577 = vmatpush.bf16.msra.mxu3 %v570_v1 }
   0x8   :  { %10 = vsyncpa [#allocation3], 0  ;;  %v38_v11 = vpack.c.bf16 %v23_v4, %v22_v3  ;;  %v40_v12 = vpack.c.bf16 %v27_v6, %v26_v5  ;;  %vm74_vm0 = vcmask 392192   ;;  %v42_v13 = vpack.c.bf16 %v31_v8, %v30_v7  ;;  %v24_v15 = vld [vmem:[%s1052_s0 + $0x10] sm:$0xff]  ;;  %v25_v16 = vld [vmem:[%s1052_s0 + $0x18] sm:$0xff]  ;;  %s537_s10 = sshll.u32 %s1057_s5, 4  ;;  %s538_s10 = int_to_ptr.hbm [resolvable:$true] %s537_s10 }
   0x9   :  { %v44_v14 = vpack.c.bf16 %v35_v10, %v34_v9  ;;  %v32_v17 = vld [vmem:[%s1052_s0 + $0x50] sm:$0xff]  ;;  %v29_v19 = vld [vmem:[%s1052_s0 + $0x38] sm:$0xff]  ;;  %v39_v23 = vpack.c.bf16 %v25_v16, %v24_v15  ;;  %v585_v27 = vld [vmem:[%s1054_s2] ss:$0 sm:$0xff]  ;;  %v648_v60 = vmov 128.0   ;;  %s650_s11 = smov 128  }
   0xa   :  { %106 = vmatpush.bf16.msra.mxu0 %v569_v2  ;;  %578 = vmatpush.bf16.msra.mxu1 %v569_v2  ;;  %v28_v18 = vld [vmem:[%s1052_s0 + $0x30] sm:$0xff]  ;;  %v33_v20 = vld [vmem:[%s1052_s0 + $0x58] sm:$0xff]  ;;  %588 = vrcp.f32 %v648_v60  ;;  %s651_s12 = smov 8  }
   0xb   :  { %579 = vmatpush.bf16.msra.mxu2 %v569_v2  ;;  %580 = vmatpush.bf16.msra.mxu3 %v569_v2  ;;  %v36_v21 = vld [vmem:[%s1052_s0 + $0x70] sm:$0xff]  ;;  %v37_v22 = vld [vmem:[%s1052_s0 + $0x78] sm:$0xff]  ;;  %v41_v24 = vpack.c.bf16 %v29_v19, %v28_v18  ;;  %v43_v25 = vpack.c.bf16 %v33_v20, %v32_v17 }
   0xc   :  { %v45_v26 = vpack.c.bf16 %v37_v22, %v36_v21 }
   0xd   :  { %561 = vmatmul.msk.bf16.vlgmr.msra.gmra.mxu0 %vm74_vm0, %v38_v11  ;;  %563 = vmatmul.msk.bf16.vlgmr.msra.gmra.mxu1 %vm74_vm0, %v40_v12 }
   0xe   :  { %565 = vmatmul.msk.bf16.vlgmr.msra.gmra.mxu2 %vm74_vm0, %v42_v13  ;;  %567 = vmatmul.msk.bf16.vlgmr.msra.gmra.mxu3 %vm74_vm0, %v44_v14 }
  0x10   :  { %v589_v61 = vpop.eup %588 }
  0x11   :  { %v181_v62 = vmul.f32 128.0, %v589_v61  ;;  %vm185_vm1 = vweird.f32 %v589_v61 }
  0x13   :  { %v182_v63 = vsub.f32 1.0, %v181_v62 }
  0x15   :  { %v183_v0 = vmul.f32 %v589_v61, %v182_v63 }
  0x17   :  { %v184_v1 = vadd.f32 %v589_v61, %v183_v0 }
  0x19   :  { %v792_v2 = vsel %vm185_vm1, %v589_v61, %v184_v1 }
  0x1d   :  { %562 = vmatmul.msk.bf16.gmra.mxu0 %vm74_vm0, %v39_v23  ;;  %564 = vmatmul.msk.bf16.gmra.mxu1 %vm74_vm0, %v41_v24 }
  0x1e   :  { %566 = vmatmul.msk.bf16.gmra.mxu2 %vm74_vm0, %v43_v25  ;;  %568 = vmatmul.msk.bf16.gmra.mxu3 %vm74_vm0, %v45_v26 }
  0x8a   :  { %v108_v28 = vpop.f32.mrf.mxu0  ;;  %v118_v29 = vpop.f32.mrf.mxu1 }
  0x8b   :  { %v109_v30 = vadd.f32 %v585_v27, %v108_v28  ;;  %v119_v31 = vadd.f32 %v585_v27, %v118_v29 }
  0x8d   :  { %156 = vadd.xlane.f32.xlu2 %v119_v31  ;;  %148 = vadd.xlane.f32.xlu0 %v109_v30 }
  0x91   :  { %v128_v32 = vpop.f32.mrf.mxu2  ;;  %v138_v33 = vpop.f32.mrf.mxu3 }
  0x92   :  { %v750_v34 = vadd.f32 %v585_v27, %v128_v32  ;;  %v752_v35 = vadd.f32 %v585_v27, %v138_v33  ;;  %v110_v36 = vpop.f32.mrf.mxu0  ;;  %v120_v37 = vpop.f32.mrf.mxu1 }
  0x93   :  { %v758_v41 = vadd.f32 %v585_v27, %v110_v36  ;;  %v760_v42 = vadd.f32 %v585_v27, %v120_v37 }
  0x95   :  { %164 = vadd.xlane.f32.xlu2 %v750_v34  ;;  %172 = vadd.xlane.f32.xlu0 %v752_v35 }
  0x99   :  { %v130_v38 = vpop.f32.mrf.mxu2  ;;  %v140_v39 = vpop.f32.mrf.mxu3 }
  0x9a   :  { %v756_v40 = vadd.f32 %v585_v27, %v140_v39  ;;  %v113_v43 = vpop.f32.mrf.mxu0  ;;  %v767_v46 = vadd.f32 %v585_v27, %v130_v38  ;;  %v123_v49 = vpop.f32.mrf.mxu1 }
  0x9b   :  { %v765_v44 = vadd.f32 %v585_v27, %v113_v43  ;;  %v773_v50 = vadd.f32 %v585_v27, %v123_v49 }
  0x9c   :  { %174 = vadd.xlane.f32.xlu1 %v756_v40 }
  0x9d   :  { %158 = vadd.xlane.f32.xlu2 %v760_v42  ;;  %150 = vadd.xlane.f32.xlu0 %v758_v41 }
  0xa1   :  { %v133_v45 = vpop.f32.mrf.mxu2  ;;  %v143_v47 = vpop.f32.mrf.mxu3 }
  0xa2   :  { %v771_v48 = vadd.f32 %v585_v27, %v133_v45  ;;  %v115_v54 = vpop.f32.mrf.mxu0  ;;  %v780_v55 = vadd.f32 %v585_v27, %v143_v47  ;;  %v125_v58 = vpop.f32.mrf.mxu1 }
  0xa3   :  { %v784_v57 = vadd.f32 %v585_v27, %v115_v54  ;;  %v789_v59 = vadd.f32 %v585_v27, %v125_v58 }
  0xa4   :  { %152 = vadd.xlane.f32.xlu1 %v765_v44 }
  0xa5   :  { %166 = vadd.xlane.f32.xlu0 %v767_v46 }
  0xa9   :  { %v135_v51 = vpop.f32.mrf.mxu2  ;;  %v145_v53 = vpop.f32.mrf.mxu3 }
  0xaa   :  { %v775_v52 = vadd.f32 %v585_v27, %v135_v51  ;;  %v782_v56 = vadd.f32 %v585_v27, %v145_v53 }
  0xac   :  { %170 = vadd.xlane.f32.xlu2 %v775_v52  ;;  %168 = vadd.xlane.f32.xlu1 %v771_v48 }
  0xad   :  { %160 = vadd.xlane.f32.xlu0 %v773_v50 }
  0xb4   :  { %176 = vadd.xlane.f32.xlu2 %v780_v55  ;;  %154 = vadd.xlane.f32.xlu1 %v784_v57 }
  0xb5   :  { %178 = vadd.xlane.f32.xlu0 %v782_v56 }
  0xbc   :  { %162 = vadd.xlane.f32.xlu1 %v789_v59 }
 0x100   :  { %v157_v3 = vpop.xlane.xlu2 %156  ;;  %v149_v4 = vpop.xlane.xlu0 %148 }
 0x101   :  { %v191_v5 = vmul.f32 %v792_v2, %v157_v3  ;;  %v187_v6 = vmul.f32 %v792_v2, %v149_v4 }
 0x103   :  { %v796_v7 = vsub.f32 %v119_v31, %v191_v5  ;;  %v798_v8 = vsub.f32 %v109_v30, %v187_v6 }
 0x105   :  { %v223_v9 = vmul.f32 %v796_v7, %v796_v7  ;;  %v219_v10 = vmul.f32 %v798_v8, %v798_v8 }
 0x107   :  { %243 = vadd.xlane.f32.xlu2 %v223_v9  ;;  %235 = vadd.xlane.f32.xlu1 %v219_v10 }
 0x108   :  { %v165_v11 = vpop.xlane.xlu2 %164  ;;  %v173_v12 = vpop.xlane.xlu0 %172 }
 0x109   :  { %v195_v13 = vmul.f32 %v792_v2, %v165_v11  ;;  %v199_v14 = vmul.f32 %v792_v2, %v173_v12 }
 0x10b   :  { %v807_v15 = vsub.f32 %v750_v34, %v195_v13  ;;  %v810_v16 = vsub.f32 %v752_v35, %v199_v14 }
 0x10d   :  { %v227_v17 = vmul.f32 %v807_v15, %v807_v15  ;;  %v231_v18 = vmul.f32 %v810_v16, %v810_v16 }
 0x10f   :  { %v175_v19 = vpop.xlane.xlu1 %174  ;;  %251 = vadd.xlane.f32.xlu0 %v227_v17  ;;  %259 = vadd.xlane.f32.xlu1 %v231_v18 }
 0x110   :  { %v159_v20 = vpop.xlane.xlu2 %158  ;;  %v151_v21 = vpop.xlane.xlu0 %150  ;;  %v200_v1 = vmul.f32 %v792_v2, %v175_v19 }
 0x111   :  { %v192_v22 = vmul.f32 %v792_v2, %v159_v20  ;;  %v188_v23 = vmul.f32 %v792_v2, %v151_v21 }
 0x112   :  { %v884_v5 = vsub.f32 %v756_v40, %v200_v1 }
 0x113   :  { %v819_v24 = vsub.f32 %v760_v42, %v192_v22  ;;  %v822_v25 = vsub.f32 %v758_v41, %v188_v23 }
 0x115   :  { %v224_v26 = vmul.f32 %v819_v24, %v819_v24  ;;  %v220_v27 = vmul.f32 %v822_v25, %v822_v25 }
 0x117   :  { %v153_v28 = vpop.xlane.xlu1 %152  ;;  %245 = vadd.xlane.f32.xlu0 %v224_v26  ;;  %237 = vadd.xlane.f32.xlu2 %v220_v27 }
 0x118   :  { %v189_v29 = vmul.f32 %v792_v2, %v153_v28  ;;  %v167_v30 = vpop.xlane.xlu0 %166 }
 0x119   :  { %v196_v31 = vmul.f32 %v792_v2, %v167_v30 }
 0x11a   :  { %v831_v32 = vsub.f32 %v765_v44, %v189_v29 }
 0x11b   :  { %v834_v33 = vsub.f32 %v767_v46, %v196_v31 }
 0x11c   :  { %v221_v34 = vmul.f32 %v831_v32, %v831_v32 }
 0x11d   :  { %v228_v35 = vmul.f32 %v834_v33, %v834_v33 }
 0x11f   :  { %v171_v36 = vpop.xlane.xlu2 %170  ;;  %v169_v37 = vpop.xlane.xlu1 %168  ;;  %239 = vadd.xlane.f32.xlu0 %v221_v34  ;;  %253 = vadd.xlane.f32.xlu1 %v228_v35 }
 0x120   :  { %v198_v38 = vmul.f32 %v792_v2, %v171_v36  ;;  %v197_v39 = vmul.f32 %v792_v2, %v169_v37  ;;  %v161_v41 = vpop.xlane.xlu0 %160 }
 0x121   :  { %v193_v42 = vmul.f32 %v792_v2, %v161_v41 }
 0x122   :  { %v844_v43 = vsub.f32 %v775_v52, %v198_v38  ;;  %v847_v44 = vsub.f32 %v771_v48, %v197_v39 }
 0x123   :  { %v850_v45 = vsub.f32 %v773_v50, %v193_v42 }
 0x124   :  { %v229_v46 = vmul.f32 %v847_v44, %v847_v44  ;;  %v230_v47 = vmul.f32 %v844_v43, %v844_v43 }
 0x125   :  { %v225_v49 = vmul.f32 %v850_v45, %v850_v45 }
 0x126   :  { %255 = vadd.xlane.f32.xlu2 %v229_v46 }
 0x127   :  { %v177_v51 = vpop.xlane.xlu2 %176  ;;  %v155_v53 = vpop.xlane.xlu1 %154  ;;  %257 = vadd.xlane.f32.xlu0 %v230_v47  ;;  %247 = vadd.xlane.f32.xlu1 %v225_v49  ;;  %v908_v49 = vld [vmem:[%s1055_s3] ss:$0 sm:$0xff]  ;;  %s649_s3 = smov [#allocation2]  }
 0x128   :  { %v201_v48 = vmul.f32 %v792_v2, %v177_v51  ;;  %v190_v52 = vmul.f32 %v792_v2, %v155_v53  ;;  %v179_v58 = vpop.xlane.xlu0 %178 }
 0x129   :  { %v202_v60 = vmul.f32 %v792_v2, %v179_v58  ;;  %v916_v58 = vld [vmem:[%s1056_s4] ss:$0 sm:$0xff]  ;;  %s535_s4 = sshll.u32 %s649_s3, 4  ;;  %s536_s4 = int_to_ptr.vmem [resolvable:$true] %s535_s4 }
 0x12a   :  { %v861_v50 = vsub.f32 %v780_v55, %v201_v48  ;;  %v864_v54 = vsub.f32 %v784_v57, %v190_v52 }
 0x12b   :  { %v873_v55 = vsub.f32 %v782_v56, %v202_v60  ;;  %v232_v56 = vmul.f32 %v884_v5, %v884_v5 }
 0x12c   :  { %v233_v61 = vmul.f32 %v861_v50, %v861_v50  ;;  %v222_v62 = vmul.f32 %v864_v54, %v864_v54 }
 0x12d   :  { %v234_v4 = vmul.f32 %v873_v55, %v873_v55 }
 0x12f   :  { %v163_v63 = vpop.xlane.xlu1 %162  ;;  %263 = vadd.xlane.f32.xlu0 %v233_v61  ;;  %241 = vadd.xlane.f32.xlu1 %v222_v62 }
 0x130   :  { %v194_v0 = vmul.f32 %v792_v2, %v163_v63 }
 0x132   :  { %v876_v57 = vsub.f32 %v789_v59, %v194_v0 }
 0x134   :  { %v226_v3 = vmul.f32 %v876_v57, %v876_v57 }
 0x136   :  { %249 = vadd.xlane.f32.xlu2 %v226_v3 }
 0x137   :  { %265 = vadd.xlane.f32.xlu1 %v234_v4 }
 0x13e   :  { %261 = vadd.xlane.f32.xlu2 %v232_v56 }
 0x17a   :  { %v244_v6 = vpop.xlane.xlu2 %243  ;;  %v236_v59 = vpop.xlane.xlu1 %235 }
 0x17b   :  { %v271_v9 = vmul.f32 %v244_v6, %v792_v2  ;;  %v267_v10 = vmul.f32 %v236_v59, %v792_v2 }
 0x17d   :  { %v287_v11 = vadd.f32 1e-06, %v271_v9  ;;  %v283_v12 = vadd.f32 1e-06, %v267_v10 }
 0x17f   :  { %590 = vrsqrt.f32 %v287_v11  ;;  %vm345_vm4 = vweird.f32 %v287_v11  ;;  %vm305_vm6 = vweird.f32 %v283_v12 }
 0x180   :  { %592 = vrsqrt.f32 %v283_v12 }
 0x182   :  { %v260_v13 = vpop.xlane.xlu1 %259  ;;  %v252_v14 = vpop.xlane.xlu0 %251 }
 0x183   :  { %v279_v17 = vmul.f32 %v260_v13, %v792_v2  ;;  %v275_v40 = vmul.f32 %v252_v14, %v792_v2 }
 0x185   :  { %v591_v18 = vpop.eup %590  ;;  %v892_v19 = vadd.f32 1e-06, %v279_v17  ;;  %v894_v20 = vadd.f32 1e-06, %v275_v40 }
 0x186   :  { %v593_v21 = vpop.eup %592  ;;  %v340_v22 = vmul.f32 %v591_v18, %v287_v11  ;;  %vm346_vm2 = vweird.f32 %v591_v18 }
 0x187   :  { %v300_v23 = vmul.f32 %v593_v21, %v283_v12  ;;  %594 = vrsqrt.f32 %v892_v19  ;;  %vm306_vm3 = vweird.f32 %v593_v21  ;;  %vm347_vm5 = vmor %vm345_vm4, %vm346_vm2  ;;  %vm425_vm10 = vweird.f32 %v892_v19 }
 0x188   :  { %v341_v26 = vmul.f32 %v591_v18, %v340_v22  ;;  %596 = vrsqrt.f32 %v894_v20  ;;  %vm307_vm7 = vmor %vm305_vm6, %vm306_vm3  ;;  %vm385_vm12 = vweird.f32 %v894_v20 }
 0x189   :  { %v301_v27 = vmul.f32 %v593_v21, %v300_v23 }
 0x18a   :  { %v342_v28 = vmul.f32 0.5, %v341_v26  ;;  %v238_v29 = vpop.xlane.xlu2 %237  ;;  %v246_v30 = vpop.xlane.xlu0 %245 }
 0x18b   :  { %v302_v31 = vmul.f32 0.5, %v301_v27  ;;  %v268_v34 = vmul.f32 %v238_v29, %v792_v2  ;;  %v272_v35 = vmul.f32 %v246_v30, %v792_v2 }
 0x18c   :  { %v343_v36 = vsub.f32 1.5, %v342_v28 }
 0x18d   :  { %v595_v37 = vpop.eup %594  ;;  %v303_v38 = vsub.f32 1.5, %v302_v31  ;;  %v900_v39 = vadd.f32 1e-06, %v268_v34  ;;  %v902_v41 = vadd.f32 1e-06, %v272_v35 }
 0x18e   :  { %v597_v42 = vpop.eup %596  ;;  %v344_v46 = vmul.f32 %v591_v18, %v343_v36  ;;  %v420_v47 = vmul.f32 %v595_v37, %v892_v19  ;;  %vm426_vm8 = vweird.f32 %v595_v37 }
 0x18f   :  { %v304_v51 = vmul.f32 %v593_v21, %v303_v38  ;;  %v380_v53 = vmul.f32 %v597_v42, %v894_v20  ;;  %598 = vrsqrt.f32 %v900_v39  ;;  %vm386_vm9 = vweird.f32 %v597_v42  ;;  %vm427_vm11 = vmor %vm425_vm10, %vm426_vm8 }
 0x190   :  { %v348_v48 = vsel %vm347_vm5, %v591_v18, %v344_v46  ;;  %v421_v52 = vmul.f32 %v595_v37, %v420_v47  ;;  %600 = vrsqrt.f32 %v902_v41  ;;  %vm387_vm13 = vmor %vm385_vm12, %vm386_vm9  ;;  %vm315_vm14 = vweird.f32 %v900_v39 }
 0x191   :  { %v463_v60 = vmul.f32 %v348_v48, %v796_v7  ;;  %v308_v61 = vsel %vm307_vm7, %v593_v21, %v304_v51  ;;  %v381_v62 = vmul.f32 %v597_v42, %v380_v53  ;;  %vm355_vm2 = vweird.f32 %v902_v41 }
 0x192   :  { %v459_v63 = vmul.f32 %v308_v61, %v798_v8  ;;  %v422_v0 = vmul.f32 0.5, %v421_v52  ;;  %v254_v1 = vpop.xlane.xlu1 %253  ;;  %v240_v3 = vpop.xlane.xlu0 %239 }
 0x193   :  { %v483_v4 = vmul.f32 %v908_v49, %v463_v60  ;;  %v382_v56 = vmul.f32 0.5, %v381_v62  ;;  %v276_v6 = vmul.f32 %v254_v1, %v792_v2  ;;  %v269_v59 = vmul.f32 %v240_v3, %v792_v2 }
 0x194   :  { %v479_v9 = vmul.f32 %v908_v49, %v459_v63  ;;  %v423_v10 = vsub.f32 1.5, %v422_v0 }
 0x195   :  { %v599_v7 = vpop.eup %598  ;;  %v503_v11 = vadd.f32 %v916_v58, %v483_v4  ;;  %v383_v12 = vsub.f32 1.5, %v382_v56  ;;  %v925_v8 = vadd.f32 1e-06, %v276_v6  ;;  %v927_v13 = vadd.f32 1e-06, %v269_v59 }
 0x196   :  { %v601_v14 = vpop.eup %600  ;;  %v499_v17 = vadd.f32 %v916_v58, %v479_v9  ;;  %v424_v40 = vmul.f32 %v595_v37, %v423_v10  ;;  %v310_v18 = vmul.f32 %v599_v7, %v900_v39  ;;  %vm316_vm15 = vweird.f32 %v599_v7 }
 0x197   :  { %519 = vst [vmem:[#allocation2 + $0x20] sm:$0xff] %v503_v11  ;;  %v384_v21 = vmul.f32 %v597_v42, %v383_v12  ;;  %v350_v22 = vmul.f32 %v601_v14, %v902_v41  ;;  %602 = vrsqrt.f32 %v925_v8  ;;  %vm356_vm0 = vweird.f32 %v601_v14  ;;  %vm317_vm1 = vmor %vm315_vm14, %vm316_vm15 }
 0x198   :  { %515 = vst [vmem:[#allocation2] sm:$0xff] %v499_v17  ;;  %v428_v23 = vsel %vm427_vm11, %v595_v37, %v424_v40  ;;  %v311_v26 = vmul.f32 %v599_v7, %v310_v18  ;;  %604 = vrsqrt.f32 %v927_v13  ;;  %vm357_vm3 = vmor %vm355_vm2, %vm356_vm0  ;;  %vm395_vm6 = vweird.f32 %v925_v8 }
 0x199   :  { %v471_v19 = vmul.f32 %v428_v23, %v810_v16  ;;  %v388_v27 = vsel %vm387_vm13, %v597_v42, %v384_v21  ;;  %v351_v28 = vmul.f32 %v601_v14, %v350_v22  ;;  %v256_v29 = vpop.xlane.xlu2 %255  ;;  %vm325_vm8 = vweird.f32 %v927_v13 }
 0x19a   :  { %v467_v30 = vmul.f32 %v388_v27, %v807_v15  ;;  %v312_v31 = vmul.f32 0.5, %v311_v26  ;;  %v277_v20 = vmul.f32 %v256_v29, %v792_v2  ;;  %v248_v34 = vpop.xlane.xlu1 %247  ;;  %v258_v35 = vpop.xlane.xlu0 %257 }
 0x19b   :  { %v491_v36 = vmul.f32 %v908_v49, %v471_v19  ;;  %v352_v37 = vmul.f32 0.5, %v351_v28  ;;  %v273_v38 = vmul.f32 %v248_v34, %v792_v2  ;;  %v278_v46 = vmul.f32 %v258_v35, %v792_v2 }
 0x19c   :  { %v487_v16 = vmul.f32 %v908_v49, %v467_v30  ;;  %v313_v42 = vsub.f32 1.5, %v312_v31  ;;  %v945_v47 = vadd.f32 1e-06, %v277_v20 }
 0x19d   :  { %v603_v15 = vpop.eup %602  ;;  %v511_v51 = vadd.f32 %v916_v58, %v491_v36  ;;  %v353_v53 = vsub.f32 1.5, %v352_v37  ;;  %v948_v48 = vadd.f32 1e-06, %v273_v38  ;;  %v952_v63 = vadd.f32 1e-06, %v278_v46 }
 0x19e   :  { %v605_v52 = vpop.eup %604  ;;  %v507_v60 = vadd.f32 %v916_v58, %v487_v16  ;;  %v314_v61 = vmul.f32 %v599_v7, %v313_v42  ;;  %v390_v62 = vmul.f32 %v603_v15, %v925_v8  ;;  %606 = vrsqrt.f32 %v945_v47 }
 0x19f   :  { %527 = vst [vmem:[#allocation2 + $0x60] sm:$0xff] %v511_v51  ;;  %v354_v0 = vmul.f32 %v601_v14, %v353_v53  ;;  %v320_v1 = vmul.f32 %v605_v52, %v927_v13  ;;  %608 = vrsqrt.f32 %v948_v48  ;;  %vm396_vm4 = vweird.f32 %v603_v15 }
 0x1a0   :  { %523 = vst [vmem:[#allocation2 + $0x40] sm:$0xff] %v507_v60  ;;  %v318_v3 = vsel %vm317_vm1, %v599_v7, %v314_v61  ;;  %v391_v4 = vmul.f32 %v603_v15, %v390_v62  ;;  %610 = vrsqrt.f32 %v952_v63  ;;  %vm326_vm5 = vweird.f32 %v605_v52  ;;  %vm397_vm7 = vmor %vm395_vm6, %vm396_vm4 }
 0x1a1   :  { %v460_v56 = vmul.f32 %v318_v3, %v822_v25  ;;  %v358_v6 = vsel %vm357_vm3, %v601_v14, %v354_v0  ;;  %v321_v59 = vmul.f32 %v605_v52, %v320_v1  ;;  %vm327_vm9 = vmor %vm325_vm8, %vm326_vm5  ;;  %vm405_vm10 = vweird.f32 %v945_v47 }
 0x1a2   :  { %v464_v39 = vmul.f32 %v358_v6, %v819_v24  ;;  %v392_v9 = vmul.f32 0.5, %v391_v4  ;;  %v242_v41 = vpop.xlane.xlu1 %241  ;;  %v264_v10 = vpop.xlane.xlu0 %263  ;;  %vm365_vm11 = vweird.f32 %v948_v48  ;;  %vm415_vm1 = vweird.f32 %v952_v63 }
 0x1a3   :  { %v480_v11 = vmul.f32 %v908_v49, %v460_v56  ;;  %v322_v12 = vmul.f32 0.5, %v321_v59  ;;  %v270_v7 = vmul.f32 %v242_v41, %v792_v2  ;;  %v281_v17 = vmul.f32 %v264_v10, %v792_v2 }
 0x1a4   :  { %v484_v40 = vmul.f32 %v908_v49, %v464_v39  ;;  %v393_v18 = vsub.f32 1.5, %v392_v9  ;;  %v968_v25 = vpop.eup %606 }
 0x1a5   :  { %v500_v24 = vadd.f32 %v916_v58, %v480_v11  ;;  %v323_v14 = vsub.f32 1.5, %v322_v12  ;;  %v971_v21 = vadd.f32 1e-06, %v270_v7  ;;  %v973_v22 = vadd.f32 1e-06, %v281_v17  ;;  %v975_v23 = vpop.eup %608 }
 0x1a6   :  { %v504_v26 = vadd.f32 %v916_v58, %v484_v40  ;;  %v394_v19 = vmul.f32 %v603_v15, %v393_v18  ;;  %v400_v27 = vmul.f32 %v968_v25, %v945_v47  ;;  %v360_v29 = vmul.f32 %v975_v23, %v948_v48  ;;  %v611_v30 = vpop.eup %610 }
 0x1a7   :  { %516 = vst [vmem:[#allocation2 + $0x8] sm:$0xff] %v500_v24  ;;  %v324_v28 = vmul.f32 %v605_v52, %v323_v14  ;;  %612 = vrsqrt.f32 %v971_v21  ;;  %v410_v13 = vmul.f32 %v611_v30, %v952_v63  ;;  %vm406_vm12 = vweird.f32 %v968_v25 }
 0x1a8   :  { %520 = vst [vmem:[#allocation2 + $0x28] sm:$0xff] %v504_v26  ;;  %v398_v31 = vsel %vm397_vm7, %v603_v15, %v394_v19  ;;  %v401_v8 = vmul.f32 %v968_v25, %v400_v27  ;;  %614 = vrsqrt.f32 %v973_v22  ;;  %v361_v35 = vmul.f32 %v975_v23, %v360_v29  ;;  %vm407_vm14 = vmor %vm405_vm10, %vm406_vm12 }
 0x1a9   :  { %v468_v20 = vmul.f32 %v398_v31, %v834_v33  ;;  %v328_v34 = vsel %vm327_vm9, %v605_v52, %v324_v28  ;;  %v250_v36 = vpop.xlane.xlu2 %249  ;;  %v411_v42 = vmul.f32 %v611_v30, %v410_v13  ;;  %vm366_vm13 = vweird.f32 %v975_v23 }
 0x1aa   :  { %v461_v37 = vmul.f32 %v328_v34, %v831_v32  ;;  %v402_v38 = vmul.f32 0.5, %v401_v8  ;;  %v362_v16 = vmul.f32 0.5, %v361_v35  ;;  %v274_v15 = vmul.f32 %v250_v36, %v792_v2  ;;  %v266_v33 = vpop.xlane.xlu1 %265  ;;  %vm367_vm0 = vmor %vm365_vm11, %vm366_vm13 }
 0x1ab   :  { %v488_v46 = vmul.f32 %v908_v49, %v468_v20  ;;  %v412_v61 = vmul.f32 0.5, %v411_v42  ;;  %v282_v56 = vmul.f32 %v266_v33, %v792_v2  ;;  %vm416_vm15 = vweird.f32 %v611_v30 }
 0x1ac   :  { %v481_v51 = vmul.f32 %v908_v49, %v461_v37  ;;  %v403_v53 = vsub.f32 1.5, %v402_v38  ;;  %v363_v60 = vsub.f32 1.5, %v362_v16  ;;  %v1000_v62 = vadd.f32 1e-06, %v274_v15  ;;  %vm417_vm2 = vmor %vm415_vm1, %vm416_vm15 }
 0x1ad   :  { %v613_v32 = vpop.eup %612  ;;  %v508_v52 = vadd.f32 %v916_v58, %v488_v46  ;;  %v413_v59 = vsub.f32 1.5, %v412_v61  ;;  %v298_v18 = vadd.f32 1e-06, %v282_v56  ;;  %vm335_vm5 = vweird.f32 %v971_v21 }
 0x1ae   :  { %v615_v0 = vpop.eup %614  ;;  %v501_v1 = vadd.f32 %v916_v58, %v481_v51  ;;  %v404_v3 = vmul.f32 %v968_v25, %v403_v53  ;;  %v330_v4 = vmul.f32 %v613_v32, %v971_v21  ;;  %v364_v6 = vmul.f32 %v975_v23, %v363_v60 }
 0x1af   :  { %524 = vst [vmem:[#allocation2 + $0x48] sm:$0xff] %v508_v52  ;;  %v440_v39 = vmul.f32 %v615_v0, %v973_v22  ;;  %616 = vrsqrt.f32 %v1000_v62  ;;  %v414_v11 = vmul.f32 %v611_v30, %v413_v59  ;;  %vm336_vm3 = vweird.f32 %v613_v32 }
 0x1b0   :  { %517 = vst [vmem:[#allocation2 + $0x10] sm:$0xff] %v501_v1  ;;  %v408_v9 = vsel %vm407_vm14, %v968_v25, %v404_v3  ;;  %v331_v41 = vmul.f32 %v613_v32, %v330_v4  ;;  %v368_v10 = vsel %vm367_vm0, %v975_v23, %v364_v6  ;;  %618 = vrsqrt.f32 %v298_v18  ;;  %vm337_vm6 = vmor %vm335_vm5, %vm336_vm3 }
 0x1b1   :  { %v469_v47 = vmul.f32 %v408_v9, %v847_v44  ;;  %v441_v12 = vmul.f32 %v615_v0, %v440_v39  ;;  %v262_v7 = vpop.xlane.xlu2 %261  ;;  %v465_v17 = vmul.f32 %v368_v10, %v850_v45  ;;  %v418_v63 = vsel %vm417_vm2, %v611_v30, %v414_v11 }
 0x1b2   :  { %v332_v40 = vmul.f32 0.5, %v331_v41  ;;  %v280_v48 = vmul.f32 %v262_v7, %v792_v2  ;;  %v470_v44 = vmul.f32 %v418_v63, %v844_v43  ;;  %vm446_vm4 = vweird.f32 %v615_v0 }
 0x1b3   :  { %v489_v25 = vmul.f32 %v908_v49, %v469_v47  ;;  %v442_v24 = vmul.f32 0.5, %v441_v12  ;;  %v485_v14 = vmul.f32 %v908_v49, %v465_v17  ;;  %vm445_vm7 = vweird.f32 %v973_v22 }
 0x1b4   :  { %v333_v23 = vsub.f32 1.5, %v332_v40  ;;  %v296_v45 = vadd.f32 1e-06, %v280_v48  ;;  %v490_v2 = vmul.f32 %v908_v49, %v470_v44  ;;  %vm447_vm8 = vmor %vm445_vm7, %vm446_vm4  ;;  %vm375_vm10 = vweird.f32 %v1000_v62 }
 0x1b5   :  { %v509_v26 = vadd.f32 %v916_v58, %v489_v25  ;;  %v443_v19 = vsub.f32 1.5, %v442_v24  ;;  %v617_v27 = vpop.eup %616  ;;  %v505_v28 = vadd.f32 %v916_v58, %v485_v14  ;;  %vm455_vm13 = vweird.f32 %v298_v18 }
 0x1b6   :  { %v334_v29 = vmul.f32 %v613_v32, %v333_v23  ;;  %v370_v43 = vmul.f32 %v617_v27, %v1000_v62  ;;  %620 = vrsqrt.f32 %v296_v45  ;;  %v510_v31 = vadd.f32 %v916_v58, %v490_v2  ;;  %v619_v21 = vpop.eup %618 }
 0x1b7   :  { %525 = vst [vmem:[#allocation2 + $0x50] sm:$0xff] %v509_v26  ;;  %v444_v30 = vmul.f32 %v615_v0, %v443_v19  ;;  %v450_v37 = vmul.f32 %v619_v21, %v298_v18  ;;  %vm376_vm9 = vweird.f32 %v617_v27  ;;  %vm456_vm12 = vweird.f32 %v619_v21 }
 0x1b8   :  { %521 = vst [vmem:[#allocation2 + $0x30] sm:$0xff] %v505_v28  ;;  %v338_v8 = vsel %vm337_vm6, %v613_v32, %v334_v29  ;;  %v371_v35 = vmul.f32 %v617_v27, %v370_v43  ;;  %vm377_vm11 = vmor %vm375_vm10, %vm376_vm9  ;;  %vm435_vm0 = vweird.f32 %v296_v45 }
 0x1b9   :  { %v462_v20 = vmul.f32 %v338_v8, %v864_v54  ;;  %v448_v34 = vsel %vm447_vm8, %v615_v0, %v444_v30  ;;  %526 = vst [vmem:[#allocation2 + $0x58] sm:$0xff] %v510_v31  ;;  %v451_v15 = vmul.f32 %v619_v21, %v450_v37  ;;  %vm457_vm14 = vmor %vm455_vm13, %vm456_vm12 }
 0x1ba   :  { %v473_v13 = vmul.f32 %v448_v34, %v861_v50  ;;  %v372_v22 = vmul.f32 0.5, %v371_v35 }
 0x1bb   :  { %v482_v36 = vmul.f32 %v908_v49, %v462_v20  ;;  %v452_v50 = vmul.f32 0.5, %v451_v15 }
 0x1bc   :  { %v493_v38 = vmul.f32 %v908_v49, %v473_v13  ;;  %v621_v46 = vpop.eup %620  ;;  %v373_v42 = vsub.f32 1.5, %v372_v22 }
 0x1bd   :  { %v502_v16 = vadd.f32 %v916_v58, %v482_v36  ;;  %v430_v33 = vmul.f32 %v621_v46, %v296_v45  ;;  %v453_v52 = vsub.f32 1.5, %v452_v50  ;;  %vm436_vm15 = vweird.f32 %v621_v46 }
 0x1be   :  { %v513_v54 = vadd.f32 %v916_v58, %v493_v38  ;;  %v374_v51 = vmul.f32 %v617_v27, %v373_v42  ;;  %vm437_vm1 = vmor %vm435_vm0, %vm436_vm15 }
 0x1bf   :  { %518 = vst [vmem:[#allocation2 + $0x18] sm:$0xff] %v502_v16  ;;  %v431_v53 = vmul.f32 %v621_v46, %v430_v33  ;;  %v454_v0 = vmul.f32 %v619_v21, %v453_v52 }
 0x1c0   :  { %529 = vst [vmem:[#allocation2 + $0x70] sm:$0xff] %v513_v54  ;;  %v378_v32 = vsel %vm377_vm11, %v617_v27, %v374_v51 }
 0x1c1   :  { %v466_v60 = vmul.f32 %v378_v32, %v876_v57  ;;  %v432_v61 = vmul.f32 0.5, %v431_v53  ;;  %v458_v4 = vsel %vm457_vm14, %v619_v21, %v454_v0 }
 0x1c2   :  { %v474_v56 = vmul.f32 %v458_v4, %v873_v55 }
 0x1c3   :  { %v486_v1 = vmul.f32 %v908_v49, %v466_v60  ;;  %v433_v3 = vsub.f32 1.5, %v432_v61 }
 0x1c4   :  { %v494_v59 = vmul.f32 %v908_v49, %v474_v56 }
 0x1c5   :  { %v506_v62 = vadd.f32 %v916_v58, %v486_v1  ;;  %v434_v6 = vmul.f32 %v621_v46, %v433_v3 }
 0x1c6   :  { %v514_v9 = vadd.f32 %v916_v58, %v494_v59 }
 0x1c7   :  { %522 = vst [vmem:[#allocation2 + $0x38] sm:$0xff] %v506_v62  ;;  %v438_v57 = vsel %vm437_vm1, %v621_v46, %v434_v6 }
 0x1c8   :  { %v472_v39 = vmul.f32 %v438_v57, %v884_v5  ;;  %530 = vst [vmem:[#allocation2 + $0x78] sm:$0xff] %v514_v9 }
 0x1ca   :  { %v492_v41 = vmul.f32 %v908_v49, %v472_v39 }
 0x1cc   :  { %v512_v55 = vadd.f32 %v916_v58, %v492_v41 }
 0x1ce   :  { %528 = vst [vmem:[#allocation2 + $0x68] sm:$0xff] %v512_v55 }
 0x1cf   :  { %543 = dma.vmem_to_hbm [thread:$0]  %s536_s4, 2048, %s538_s10, [#allocation3], %s650_s11, %s650_s11, %s651_s12  }
 0x1d0   :  { %646 = dma.done.wait [#allocation3], 2048  }
 0x1d1   :  { %647 = vsyncadd [#allocation3], 4294965248 }
 0x1d2   :  { %548 = vsyncpa [#allocation3], 1 }

</bundles_post_ra>
